<compile_context>
chip_gen: v7x
topology: tpu7x:2x2x1
jax: 0.10.0
libtpu: 0.0.40
codegen_flags: <defaults>
</compile_context>

<pallas_src>
import functools

import jax
import jax.numpy as jnp
from jax.experimental import pallas as pl
from jax.experimental.pallas import tpu as pltpu


def _conv1x1_bn_relu_kernel(x_ref, w_ref, b_ref, o_ref):
    # x_ref: (Bn, Cin, T)   lane-dense spatial tile of Bn batch elements
    # w_ref: (Cout, Cin)    1x1 conv weight with BN scale folded in (resident)
    # b_ref: (Cout, 1)      folded bias = scale*(conv_bias - mean) + beta (f32)
    # o_ref: (Bn, Cout, T)  lane-dense output tile
    w = w_ref[...]
    b = b_ref[...]
    for bi in range(x_ref.shape[0]):  # static unroll; Bn is small
        acc = jnp.dot(w, x_ref[bi], preferred_element_type=jnp.float32)
        o_ref[bi] = jnp.maximum(acc + b, 0.0).astype(o_ref.dtype)


def _round_down_128(x):
    return (x // 128) * 128


def _round_up_128(x):
    return ((x + 127) // 128) * 128


def _vmem_budgets():
    # Generation-aware VMEM sizing: v7x has 64 MiB physical (32 MiB scoped
    # default), v5e/v6e have 128 MiB (16/32 MiB scoped defaults).
    vmem_cap = 128 << 20
    try:
        vmem_cap = int(pltpu.get_tpu_info().vmem_capacity_bytes)
    except Exception:
        pass
    vmem_limit = int(min(vmem_cap // 2, 48 << 20))   # scoped limit we request
    block_budget = vmem_limit // 3                   # double-buffered blocks
    return vmem_limit, block_budget


def _choose_tiling(N, Cin, Cout, HW, itemsize, block_budget):
    # Per-batch-element lane tile: multiple of 128, never larger than H*W
    # (when H*W < 128 the lane dim must equal the full array dim).
    t_max = HW if HW <= 128 else _round_down_128(HW)

    # Pack several batch elements per grid step when the spatial extent is
    # small, so each step moves enough bytes to amortize the ~0.35us fixed
    # per-step pipeline overhead.
    target_lanes = 8192
    Bn = 1
    if N > 1 and t_max < target_lanes:
        Bn = min(N, max(1, target_lanes // max(t_max, 1)))
        while N % Bn:     # keep exact batch blocks (no ragged leading dim)
            Bn -= 1

    # Cap T so the double-buffered input+output blocks fit the VMEM budget.
    per_lane = 2 * Bn * (Cin + Cout) * itemsize
    t_vmem = max(128, (block_budget // per_lane) // 128 * 128)
    T = min(t_max, t_vmem, 32768)

    # Safety: shrink Bn if the working set still exceeds the budget
    # (only relevant for very large channel counts).
    while Bn > 1 and 2 * Bn * (Cin + Cout) * itemsize * T > block_budget:
        Bn = max(1, Bn // 2)
        while N % Bn:
            Bn -= 1

    # v7x has two TensorCores: guarantee >= 2 "parallel" grid steps when
    # possible (no effect on single-TC v5e/v6e).
    if (N // Bn) * pl.cdiv(HW, T) < 2:
        if Bn > 1:
            Bn = max(1, Bn // 2)
            while N % Bn:
                Bn -= 1
        elif HW > 128:
            T = min(t_max, max(128, _round_up_128(pl.cdiv(HW, 2))))

    return Bn, T


@functools.partial(jax.jit, static_argnames=("eps",))
def basic_conv_forward(x_nchw, w, conv_bias, gamma, beta, run_mean, run_var,
                       eps=1e-5):
    """Forward of basic_conv: Conv2d(1x1) -> BatchNorm2d (eval) -> ReLU.

    x_nchw: (N, Cin, H, W)
    w:      (Cout, Cin)   1x1 conv weight (kernel dims squeezed)
    conv_bias, gamma, beta, run_mean, run_var: (Cout,)
    Returns (N, Cout, H, W) in x_nchw.dtype.
    """
    N, Cin, H, W = x_nchw.shape
    Cout = w.shape[0]
    HW = H * W
    dtype = x_nchw.dtype
    itemsize = jnp.dtype(dtype).itemsize

    # Fold eval-mode BatchNorm into the conv (f32 fold math for accuracy;
    # weight stored in the activation dtype for the MXU).
    scale = (gamma.astype(jnp.float32)
             / jnp.sqrt(run_var.astype(jnp.float32) + eps))            # (Cout,)
    w_scaled = (w.astype(jnp.float32) * scale[:, None]).astype(dtype)   # (Cout, Cin)
    bias2d = (scale * (conv_bias.astype(jnp.float32)
                       - run_mean.astype(jnp.float32))
              + beta.astype(jnp.float32)).reshape(Cout, 1)               # f32

    # NCHW -> (N, Cin, H*W): free reshape; spatial on the lane (last) dim.
    x3d = x_nchw.reshape(N, Cin, HW)

    vmem_limit, block_budget = _vmem_budgets()
    Bn, T = _choose_tiling(N, Cin, Cout, HW, itemsize, block_budget)
    grid = (N // Bn, pl.cdiv(HW, T))

    # TODO(synk): for very large Cin/Cout add Cout/K grid axes (<=256 MXU
    # tiles); unnecessary at this module's typical channel counts.
    out3d = pl.pallas_call(
        _conv1x1_bn_relu_kernel,
        out_shape=jax.ShapeDtypeStruct((N, Cout, HW), dtype),
        grid_spec=pltpu.PrefetchScalarGridSpec(
            num_scalar_prefetch=0,
            grid=grid,
            in_specs=[
                # Bn batch elems per step; ragged last spatial block is masked.
                pl.BlockSpec((Bn, Cin, T), lambda n, s: (n, 0, s)),
                # full (small) weight / bias, resident across the grid
                pl.BlockSpec((Cout, Cin), lambda n, s: (0, 0)),
                pl.BlockSpec((Cout, 1), lambda n, s: (0, 0)),
            ],
            out_specs=pl.BlockSpec((Bn, Cout, T), lambda n, s: (n, 0, s)),
        ),
        compiler_params=pltpu.CompilerParams(
            dimension_semantics=("parallel", "parallel"),
            vmem_limit_bytes=vmem_limit,
        ),
    )(x3d, w_scaled, bias2d)

    return out3d.reshape(N, Cout, H, W)


def _reference(x_nchw, w, conv_bias, gamma, beta, run_mean, run_var, eps=1e-5):
    # Pure-JAX reference (same math, NCHW).
    z = jnp.einsum("nchw,oc->nohw", x_nchw, w) + conv_bias[None, :, None, None]
    scale = gamma / jnp.sqrt(run_var + eps)
    y = scale[None, :, None, None] * (z - run_mean[None, :, None, None]) \
        + beta[None, :, None, None]
    return jnp.maximum(y, 0.0)


if __name__ == "__main__":
    N, Cin, Cout = 2, 4, 8  # inter_channels = 8

    def make_inputs(key, H, W):
        ks = jax.random.split(key, 7)
        x = jax.random.normal(ks[0], (N, Cin, H, W), dtype=jnp.float32)
        w = jax.random.normal(ks[1], (Cout, Cin), dtype=jnp.float32) * 0.1
        conv_bias = jax.random.normal(ks[2], (Cout,), dtype=jnp.float32) * 0.1
        gamma = 1.0 + 0.1 * jax.random.normal(ks[3], (Cout,), dtype=jnp.float32)
        beta = 0.1 * jax.random.normal(ks[4], (Cout,), dtype=jnp.float32)
        run_mean = 0.1 * jax.random.normal(ks[5], (Cout,), dtype=jnp.float32)
        run_var = jnp.abs(1.0 + 0.1 * jax.random.normal(ks[6], (Cout,),
                                                        dtype=jnp.float32))
        return x, w, conv_bias, gamma, beta, run_mean, run_var

    # Case 1: H*W is a multiple of 128.
    args = make_inputs(jax.random.PRNGKey(0), 16, 16)
    out = jax.block_until_ready(basic_conv_forward(*args))
    ref = _reference(*args)
    assert out.shape == (N, Cout, 16, 16)
    assert jnp.allclose(out, ref, atol=1e-4, rtol=1e-4)

    # Case 2: ragged spatial extent (H*W not a multiple of the lane tile) —
    # exercises the masked last spatial block (no pad/slice in the wrapper).
    args2 = make_inputs(jax.random.PRNGKey(1), 20, 20)
    out2 = jax.block_until_ready(basic_conv_forward(*args2))
    ref2 = _reference(*args2)
    assert out2.shape == (N, Cout, 20, 20)
    assert jnp.allclose(out2, ref2, atol=1e-4, rtol=1e-4)

    print("KERNEL_OK")
</pallas_src>

<mosaic_0001>
module attributes {stable_mosaic.version = 11 : i64} {
  func.func @_conv1x1_bn_relu_kernel(%arg0: i32, %arg1: i32, %arg2: memref<1x4x256xf32, #tpu.memory_space<vmem>>, %arg3: memref<8x4xf32, #tpu.memory_space<vmem>>, %arg4: memref<8x1xf32, #tpu.memory_space<vmem>>, %arg5: memref<1x8x256xf32, #tpu.memory_space<vmem>>) attributes {dimension_semantics = [#tpu.dimension_semantics<parallel>, #tpu.dimension_semantics<parallel>], iteration_bounds = array<i64: 2, 1>, scalar_prefetch = 0 : i64, scratch_operands = 0 : i64, tpu.core_type = #tpu.core_type<tc>, window_params = [{transform_indices = @transform_0, window_bounds = array<i64: 1, 4, 256>}, {pipeline_mode = #tpu.pipeline_mode<synchronous>, transform_indices = @transform_1, window_bounds = array<i64: 8, 4>}, {pipeline_mode = #tpu.pipeline_mode<synchronous>, transform_indices = @transform_2, window_bounds = array<i64: 8, 1>}, {transform_indices = @transform_3, window_bounds = array<i64: 1, 8, 256>}]} {
    %c0 = arith.constant 0 : index
    %c0_0 = arith.constant 0 : index
    %0 = vector.load %arg3[%c0, %c0_0] : memref<8x4xf32, #tpu.memory_space<vmem>>, vector<8x4xf32>
    %c0_1 = arith.constant 0 : index
    %c0_2 = arith.constant 0 : index
    %1 = vector.load %arg4[%c0_1, %c0_2] : memref<8x1xf32, #tpu.memory_space<vmem>>, vector<8x1xf32>
    %c0_3 = arith.constant 0 : index
    %c0_4 = arith.constant 0 : index
    %c0_5 = arith.constant 0 : index
    %2 = vector.load %arg2[%c0_3, %c0_4, %c0_5] : memref<1x4x256xf32, #tpu.memory_space<vmem>>, vector<1x4x256xf32>
    %3 = vector.shape_cast %2 : vector<1x4x256xf32> to vector<4x256xf32>
    %cst = arith.constant dense<0.000000e+00> : vector<8x256xf32>
    %4 = tpu.matmul %0, %3, %cst {dimension_numbers = #tpu.dot_dimension_numbers<[1], [0], [0], [1], [0, 0, 1, 1], [], []>} : vector<8x4xf32>, vector<4x256xf32>, vector<8x256xf32> -> vector<8x256xf32>
    %5 = vector.broadcast %1 : vector<8x1xf32> to vector<8x256xf32>
    %6 = arith.addf %4, %5 : vector<8x256xf32>
    %cst_6 = arith.constant 0.000000e+00 : f32
    %7 = vector.broadcast %cst_6 : f32 to vector<8x256xf32>
    %8 = arith.maximumf %6, %7 : vector<8x256xf32>
    %c0_7 = arith.constant 0 : index
    %c0_8 = arith.constant 0 : index
    %c0_9 = arith.constant 0 : index
    %9 = vector.load %arg5[%c0_7, %c0_8, %c0_9] : memref<1x8x256xf32, #tpu.memory_space<vmem>>, vector<1x8x256xf32>
    %10 = vector.shape_cast %9 : vector<1x8x256xf32> to vector<8x256xf32>
    %11 = vector.shape_cast %8 : vector<8x256xf32> to vector<1x8x256xf32>
    tpu.vector_store %arg5[%c0_7, %c0_8, %c0_9], %11 {strides = array<i32>} : memref<1x8x256xf32, #tpu.memory_space<vmem>>, vector<1x8x256xf32>,
    return
  }
  func.func @transform_0(%arg0: i32, %arg1: i32) -> (i32, i32, i32) {
    %c0_i32 = arith.constant 0 : i32
    %c0_i32_0 = arith.constant 0 : i32
    return %arg0, %c0_i32, %arg1 : i32, i32, i32
  }
  func.func @transform_1(%arg0: i32, %arg1: i32) -> (i32, i32) {
    %c0_i32 = arith.constant 0 : i32
    %c0_i32_0 = arith.constant 0 : i32
    %c0_i32_1 = arith.constant 0 : i32
    return %c0_i32, %c0_i32_0 : i32, i32
  }
  func.func @transform_2(%arg0: i32, %arg1: i32) -> (i32, i32) {
    %c0_i32 = arith.constant 0 : i32
    %c0_i32_0 = arith.constant 0 : i32
    %c0_i32_1 = arith.constant 0 : i32
    return %c0_i32, %c0_i32_0 : i32, i32
  }
  func.func @transform_3(%arg0: i32, %arg1: i32) -> (i32, i32, i32) {
    %c0_i32 = arith.constant 0 : i32
    %c0_i32_0 = arith.constant 0 : i32
    return %arg0, %c0_i32, %arg1 : i32, i32, i32
  }
}

</mosaic_0001>

<bundles_post_ra>
// kernel: basic_conv_forward.1
= control target key start
LH: loop header
LB: loop body
LE: loop exit
PB: predicated region body
PF: predicated region fallthrough
CT: control target
= control target key end

     0   :  { %s481_s12 = smov 0   ;;  %s483_s13 = smov 0   ;;  %s520_s0 = inlined_call_operand.vmem [shape: f32[2,4,256], index: 0, kind: input, shape index: {}]   ;;  %s521_s1 = inlined_call_operand.vmem [shape: f32[8,4], index: 1, kind: input, shape index: {}]   ;;  %s522_s2 = inlined_call_operand.vmem [shape: f32[8,1], index: 2, kind: input, shape index: {}]   ;;  %s523_s3 = inlined_call_operand.vmem [shape: f32[2,8,256], index: 3, kind: output, shape index: {}]  }
   0x1   :  { %s485_s14 = smov 0  }
   0x2 LB: > { %s25_s15 = sadd.s32 1, %s453_s13  ;;  %p395_p0 = scmp.ge.s32.totalorder %s457_s14, 1  ;;  %s457_s14 = sphi %s485_s14, %s13_s14   ;;  %s453_s13 = sphi %s483_s13, %s525_s13   ;;  %s449_s12 = sphi %s481_s12, %s524_s12  }
   0x3   : > { %p27_p1 = scmp.ge.s32.totalorder %s25_s15, 2  ;;  %p158_p2 = scmp.lt.s32.totalorder %s457_s14, 3 }
   0x5   : > { %s527_s15 = smov (%p27_p1, %s25_s15), 0  ;;  %p159_p3 = pnand %p395_p0, %p158_p2 }
   0x6   : > { %p191_p4 = scmp.lt.s32.totalorder (!%p159_p3), %s449_s12, 1  ;;  %v459_v0 = vmov (!%p159_p3), 0.0   ;;  %v460_v1 = vmov (!%p159_p3), 0   ;;  %v211_v2 = vld [vmem:[%s522_s2] sm:$0xff] (!%p159_p3)  ;;  %vm224_vm0 = vcmask (!%p159_p3), 1043456   ;;  %vm220_vm1 = vcmask (!%p159_p3), 31744  }
   0x7   : > { %162 = sbr.rel (%p159_p3) target bundleno = 240 (0xf0), region = 32  ;;  %293 = vmatprep.mubr.f32.mxu0 (!%p159_p3), %v459_v0  ;;  %433 = vset.pattern.permute.xlu0 (!%p159_p3), %v460_v1  ;;  %v210_v5 = vld [vmem:[%s521_s1] sm:$0xff] (!%p159_p3) }
   0x8   : > { %215 = vperm.xlu0 (!%p159_p3), %433, %v211_v2  }
   0xe   : > { %s529_s12 = smov (!%p191_p4, %s449_s12), 1 }
   0xf   : > { %s405_s18 = sshll.u32 %s529_s12, 3  ;;  %s406_s24 = sshll.u32 %s529_s12, 4 }
  0x10   : > { %s198_s21 = scalar_lea.vmem %s520_s0, %s405_s18  ;;  %s208_s27 = scalar_lea.vmem %s523_s3, %s406_s24 }
  0x11   : > { %v212_v3 = vld [vmem:[%s198_s21] sm:$0xff] }
  0x12   : > { %v219_v4 = vcombine.high %v212_v3, %v212_v3 }
  0x14   : > { %400 = vmatprep.subr.msk.mxu0 %vm224_vm0, %v219_v4 }
  0x15   : > { %401 = vmatpush1.msk.msra.mxu0 %vm224_vm0, %v212_v3 }
  0x16   : > { %402 = vmatmul.mubr.msk.f32.vlgmr.msra.gmra.mrb[0].mxu0 %vm220_vm1, %v210_v5 }
  0x87   : > { %v216_v6 = vpop.permute.xlu0 %215 }
  0xe9   : > { %v295_v7 = vpop.f32.mrb[0].mxu0 }
  0xea   : > { %v296_v8 = vadd.f32 %v295_v7, %v216_v6  ;;  %v297_v9 = vpop.f32.mrb[1].mxu0 }
  0xeb   : > { %v298_v10 = vadd.f32 %v297_v9, %v216_v6 }
  0xec   : > { %v300_v11 = vmax.f32 %v296_v8, 0.0 }
  0xed   : > { %v301_v12 = vmax.f32 %v298_v10, 0.0 }
  0xee   : > { %302 = vst [vmem:[%s208_s27] sm:$0xff] %v300_v11 }
  0xef   : > { %303 = vst [vmem:[%s208_s27 + $0x8] sm:$0xff] %v301_v12 }
  0xf0 PF: > { %s13_s14 = sadd.s32 1, %s457_s14   ;;  %s524_s12 = smov %s453_s13 }
  0xf1   : > { %p10_p5 = scmp.ge.s32.totalorder %s13_s14, 4   ;;  %s525_s13 = smov %s527_s15 }
  0xf3   :  { %12 = sbr.rel (!%p10_p5) target bundleno = 2 (0x2), region = 62 }

</bundles_post_ra>
